<compile_context>
chip_gen: v7x
topology: tpu7x:2x2x1
jax: 0.10.0
libtpu: 0.0.40
codegen_flags: <defaults>
</compile_context>

<pallas_src>
import jax
import jax.numpy as jnp
from jax.experimental import pallas as pl
from jax.experimental.pallas import tpu as pltpu

_HEADROOM = 2 << 20  # compiler / internal-scratch slack inside our estimates


def _round_up(n: int, m: int) -> int:
    return ((n + m - 1) // m) * m


def _divisor_tiles(total: int):
    """Multiples of 128 dividing `total` (itself a multiple of 128), descending."""
    return [t for t in range(total, 127, -128) if total % t == 0]


def _chip_vmem_bytes() -> int:
    try:
        return int(pltpu.get_tpu_info().vmem_capacity_bytes)
    except Exception:
        return 64 << 20  # v7x per-TC VMEM = smallest across generations


# --------------------------------------------------------------------------
# Kernels
# --------------------------------------------------------------------------
def _mlp_kernel_resident(x_ref, w1_ref, b1_ref, w2_ref, b2_ref, o_ref):
    """grid = (batch tiles,).  Weight/bias BlockSpecs use constant index_maps,
    so they are fetched into VMEM once and stay resident across all batch
    tiles (no per-tile weight re-streaming from HBM)."""
    h = jnp.dot(x_ref[...], w1_ref[...], preferred_element_type=jnp.float32)
    h = jnp.maximum(h + b1_ref[...], 0.0)                    # bias+ReLU in f32
    o_ref[...] = (jnp.dot(h.astype(w2_ref.dtype), w2_ref[...],
                          preferred_element_type=jnp.float32)
                  + b2_ref[...]).astype(o_ref.dtype)


def _mlp_kernel_chunked(x_ref, w1_ref, b1_ref, w2_ref, b2_ref, o_ref, acc_ref):
    """grid = (batch tiles, C tiles, H chunks); the H axis is the reduction
    ("arbitrary", last).  acc_ref is initialized with b2 so finalize is just a
    cast.  fc1 work is recomputed per C tile, which only matters when C is
    large enough to need tiling (where fc2 FLOPs dominate anyway)."""
    hk = pl.program_id(2)

    @pl.when(hk == 0)
    def _init():
        acc_ref[...] = jnp.broadcast_to(b2_ref[...], acc_ref.shape)

    # fc1 chunk: [tile_b, Dp] @ [Dp, tile_h] -> f32 on the MXU.
    h = jnp.dot(x_ref[...], w1_ref[...], preferred_element_type=jnp.float32)
    h = jnp.maximum(h + b1_ref[...], 0.0)

    # fc2 partial: [tile_b, tile_h] @ [tile_h, tile_c], f32 accumulation.
    acc_ref[...] += jnp.dot(h.astype(w2_ref.dtype), w2_ref[...],
                            preferred_element_type=jnp.float32)

    @pl.when(hk == pl.num_programs(2) - 1)
    def _finalize():
        o_ref[...] = acc_ref[...].astype(o_ref.dtype)


# --------------------------------------------------------------------------
# Packing (one-time; hoisted out of the per-call path)
# --------------------------------------------------------------------------
def pack_mlp_params(w1, b1, w2, b2, *, use_bf16=True):
    """Pad weights/biases to lane multiples of 128 and cast matmul operands to
    the MXU dtype once, so repeated forwards don't redo the HBM round-trip."""
    D, H = w1.shape
    H2, C = w2.shape
    assert H2 == H and b1.shape == (H,) and b2.shape == (C,)
    Dp, Hp, Cp = (_round_up(d, 128) for d in (D, H, C))
    in_dtype = jnp.bfloat16 if use_bf16 else jnp.dtype(w1.dtype)

    def pad2(a, r, c):
        pr, pc = r - a.shape[0], c - a.shape[1]
        return a if (pr == 0 and pc == 0) else jnp.pad(a, ((0, pr), (0, pc)))

    return dict(
        w1=pad2(w1, Dp, Hp).astype(in_dtype),
        w2=pad2(w2, Hp, Cp).astype(in_dtype),
        b1=pad2(b1.reshape(1, H).astype(jnp.float32), 1, Hp),  # biases stay f32
        b2=pad2(b2.reshape(1, C).astype(jnp.float32), 1, Cp),
        dims=(D, H, C),
        pdims=(Dp, Hp, Cp),
        in_dtype=in_dtype,
    )


# --------------------------------------------------------------------------
# Tile selection against the per-chip VMEM budget
# --------------------------------------------------------------------------
def _select_tiles(B, Dp, Hp, Cp, in_sz, out_sz, sub, budget,
                  tile_b, tile_h, tile_c, force_chunked):
    Bp_min = _round_up(B, sub)

    if tile_b is not None:
        tb_cands = [_round_up(min(tile_b, Bp_min), sub)]
    else:
        tb_cands = []
        for t in (256, 128):                 # prefer 256 (v6e/v7x MXU width)
            t = _round_up(min(t, Bp_min), sub)
            if t not in tb_cands:
                tb_cands.append(t)

    # ---- Path A: weights resident in VMEM, batch-only grid ----------------
    def resident_bytes(tb):
        # BlockSpec inputs are double-buffered even with constant index_maps.
        w = 2 * ((Dp * Hp + Hp * Cp) * in_sz + 8 * (Hp + Cp) * 4)
        io = 2 * tb * (Dp * in_sz + Cp * out_sz)
        inter = tb * (Hp + Cp) * 4           # live f32 intermediates
        return w + io + inter + _HEADROOM

    if not force_chunked and tile_h is None and tile_c is None:
        for tb in tb_cands:
            need = resident_bytes(tb)
            if need <= budget:
                return dict(path="resident", tile_b=tb, vmem_needed=need)

    # ---- Path B: H-chunked (+ optional C tiling) ---------------------------
    th_cands = [tile_h] if tile_h is not None else _divisor_tiles(Hp)
    tc_cands = [tile_c] if tile_c is not None else _divisor_tiles(Cp)

    def chunked_bytes(tb, th, tc):
        per_step = (tb * Dp * in_sz + Dp * th * in_sz + 8 * th * 4
                    + th * tc * in_sz + 8 * tc * 4 + tb * tc * out_sz)
        return 2 * per_step + tb * tc * 4 + tb * th * 4 + _HEADROOM

    def search(th_list):
        for tb in tb_cands:
            for tc in tc_cands:
                for th in th_list:
                    need = chunked_bytes(tb, th, tc)
                    if need <= budget:
                        return dict(path="chunked", tile_b=tb, tile_h=th,
                                    tile_c=tc, vmem_needed=need)
        return None

    big_th = [t for t in th_cands if t >= 256] or th_cands
    cfg = search(big_th) or search(th_cands)
    if cfg is not None:
        return cfg

    # Nothing fits the advisory budget: use the smallest-footprint config.
    tb, th, tc = tb_cands[-1], th_cands[-1], tc_cands[-1]
    return dict(path="chunked", tile_b=tb, tile_h=th, tile_c=tc,
                vmem_needed=chunked_bytes(tb, th, tc))


# --------------------------------------------------------------------------
# Forward
# --------------------------------------------------------------------------
def mlp_forward_packed(x, params, *, tile_b=None, tile_h=None, tile_c=None,
                       force_chunked=False):
    """x:[B,D] -> [B,C] using packed (padded/cast) params from pack_mlp_params."""
    D, H, C = params["dims"]
    Dp, Hp, Cp = params["pdims"]
    in_dtype = params["in_dtype"]
    B = x.shape[0]
    assert x.shape == (B, D)
    out_dtype = x.dtype

    in_sz = jnp.dtype(in_dtype).itemsize
    out_sz = jnp.dtype(out_dtype).itemsize
    sub = 16 if in_sz == 2 else 8            # sublane packing (bf16 packs 16)

    chip_vmem = _chip_vmem_bytes()
    budget = int(chip_vmem * 0.85)           # leave headroom for Mosaic scratch

    cfg = _select_tiles(B, Dp, Hp, Cp, in_sz, out_sz, sub, budget,
                        tile_b, tile_h, tile_c, force_chunked)
    tb = cfg["tile_b"]
    Bp = _round_up(max(B, tb), tb)

    x_p = x
    if (Bp, Dp) != (B, D):
        x_p = jnp.pad(x, ((0, Bp - B), (0, Dp - D)))
    x_p = x_p.astype(in_dtype)

    w1_p, b1_p = params["w1"], params["b1"]
    w2_p, b2_p = params["w2"], params["b2"]

    cost = pl.CostEstimate(
        flops=2 * Bp * (Dp * Hp + Hp * Cp),
        transcendentals=0,
        bytes_accessed=(Bp * Dp * in_sz + Dp * Hp * in_sz + Hp * Cp * in_sz
                        + (Hp + Cp) * 4 + Bp * Cp * out_sz),
    )
    vmem_limit = int(min(max(cfg["vmem_needed"], 32 << 20), budget))

    if cfg["path"] == "resident":
        grid = (Bp // tb,)
        out_p = pl.pallas_call(
            _mlp_kernel_resident,
            out_shape=jax.ShapeDtypeStruct((Bp, Cp), out_dtype),
            grid_spec=pltpu.PrefetchScalarGridSpec(
                num_scalar_prefetch=0,
                grid=grid,
                in_specs=[
                    pl.BlockSpec((tb, Dp), lambda i: (i, 0)),   # x tile
                    pl.BlockSpec((Dp, Hp), lambda i: (0, 0)),   # W1 (resident)
                    pl.BlockSpec((1, Hp), lambda i: (0, 0)),    # b1 (resident)
                    pl.BlockSpec((Hp, Cp), lambda i: (0, 0)),   # W2 (resident)
                    pl.BlockSpec((1, Cp), lambda i: (0, 0)),    # b2 (resident)
                ],
                out_specs=pl.BlockSpec((tb, Cp), lambda i: (i, 0)),
            ),
            compiler_params=pltpu.CompilerParams(
                dimension_semantics=("parallel",),
                vmem_limit_bytes=vmem_limit,
            ),
            cost_estimate=cost,
        )(x_p, w1_p, b1_p, w2_p, b2_p)
    else:
        th, tc = cfg["tile_h"], cfg["tile_c"]
        assert Hp % th == 0 and th % 128 == 0
        assert Cp % tc == 0 and tc % 128 == 0
        grid = (Bp // tb, Cp // tc, Hp // th)   # reduction (H) axis last
        out_p = pl.pallas_call(
            _mlp_kernel_chunked,
            out_shape=jax.ShapeDtypeStruct((Bp, Cp), out_dtype),
            grid_spec=pltpu.PrefetchScalarGridSpec(
                num_scalar_prefetch=0,
                grid=grid,
                in_specs=[
                    pl.BlockSpec((tb, Dp), lambda i, j, hk: (i, 0)),   # x tile
                    pl.BlockSpec((Dp, th), lambda i, j, hk: (0, hk)),  # W1 chunk
                    pl.BlockSpec((1, th), lambda i, j, hk: (0, hk)),   # b1 chunk
                    pl.BlockSpec((th, tc), lambda i, j, hk: (hk, j)),  # W2 chunk
                    pl.BlockSpec((1, tc), lambda i, j, hk: (0, j)),    # b2 chunk
                ],
                out_specs=pl.BlockSpec((tb, tc), lambda i, j, hk: (i, j)),
                scratch_shapes=[pltpu.VMEM((tb, tc), jnp.float32)],
            ),
            compiler_params=pltpu.CompilerParams(
                # On v7x, consider pltpu.CORE_PARALLEL on the batch axis if
                # profiling shows the grid is not sharded across the 2 TCs.
                dimension_semantics=("parallel", "parallel", "arbitrary"),
                vmem_limit_bytes=vmem_limit,
            ),
            cost_estimate=cost,
        )(x_p, w1_p, b1_p, w2_p, b2_p)

    return out_p[:B, :C]


def mlp_forward(x, w1, b1, w2, b2, *, use_bf16=True, **kw):
    """Convenience wrapper: pack once, run once."""
    packed = pack_mlp_params(w1, b1, w2, b2, use_bf16=use_bf16)
    return mlp_forward_packed(x, packed, **kw)


# --------------------------------------------------------------------------
if __name__ == "__main__":
    key = jax.random.PRNGKey(0)
    ks = jax.random.split(key, 10)

    # ---- Case 1: small, unaligned shapes (as the module implies), pure f32,
    #      resident-weight path; exercises the padding logic.
    B, D, H, C = 8, 32, 64, 10
    x = jax.random.normal(ks[0], (B, D), dtype=jnp.float32)
    w1 = jax.random.normal(ks[1], (D, H), dtype=jnp.float32) * 0.1
    b1 = jax.random.normal(ks[2], (H,), dtype=jnp.float32) * 0.1
    w2 = jax.random.normal(ks[3], (H, C), dtype=jnp.float32) * 0.1
    b2 = jax.random.normal(ks[4], (C,), dtype=jnp.float32) * 0.1

    out = jax.block_until_ready(mlp_forward(x, w1, b1, w2, b2, use_bf16=False))
    ref = jnp.maximum(x @ w1 + b1, 0.0) @ w2 + b2
    assert out.shape == (B, C)
    assert jnp.allclose(out, ref, atol=1e-3, rtol=1e-3), float(
        jnp.max(jnp.abs(out - ref)))

    # ---- Case 2: MXU-aligned shapes, bf16 MXU inputs, packed weights reused
    #      across both the resident path and the forced-chunked path (checks
    #      the accumulator / C-tiling / multi-batch-tile machinery).
    B2, D2, H2, C2 = 256, 128, 256, 128
    x2 = jax.random.normal(ks[5], (B2, D2), dtype=jnp.float32)
    w12 = jax.random.normal(ks[6], (D2, H2), dtype=jnp.float32) * 0.1
    b12 = jax.random.normal(ks[7], (H2,), dtype=jnp.float32) * 0.1
    w22 = jax.random.normal(ks[8], (H2, C2), dtype=jnp.float32) * 0.1
    b22 = jax.random.normal(ks[9], (C2,), dtype=jnp.float32) * 0.1

    packed = pack_mlp_params(w12, b12, w22, b22, use_bf16=True)
    out_res = jax.block_until_ready(
        mlp_forward_packed(x2, packed, tile_b=128))                    # resident
    out_chk = jax.block_until_ready(
        mlp_forward_packed(x2, packed, tile_b=128, tile_h=128, tile_c=128,
                           force_chunked=True))                        # chunked

    xb, w1b, w2b = (a.astype(jnp.bfloat16) for a in (x2, w12, w22))
    h_ref = jnp.maximum(
        jnp.dot(xb, w1b, preferred_element_type=jnp.float32) + b12, 0.0)
    ref2 = jnp.dot(h_ref.astype(jnp.bfloat16), w2b,
                   preferred_element_type=jnp.float32) + b22
    for o in (out_res, out_chk):
        assert o.shape == (B2, C2)
        assert jnp.allclose(o, ref2, atol=2e-2, rtol=2e-2), float(
            jnp.max(jnp.abs(o - ref2)))

    print("KERNEL_OK")
</pallas_src>

<mosaic_0001>
module attributes {stable_mosaic.version = 11 : i64} {
  func.func @_mlp_kernel_resident(%arg0: i32, %arg1: memref<8x128xf32, #tpu.memory_space<vmem>>, %arg2: memref<128x128xf32, #tpu.memory_space<vmem>>, %arg3: memref<1x128xf32, #tpu.memory_space<vmem>>, %arg4: memref<128x128xf32, #tpu.memory_space<vmem>>, %arg5: memref<1x128xf32, #tpu.memory_space<vmem>>, %arg6: memref<8x128xf32, #tpu.memory_space<vmem>>) attributes {dimension_semantics = [#tpu.dimension_semantics<parallel>], iteration_bounds = array<i64: 1>, scalar_prefetch = 0 : i64, scratch_operands = 0 : i64, tpu.core_type = #tpu.core_type<tc>, window_params = [{transform_indices = @transform_0, window_bounds = array<i64: 8, 128>}, {pipeline_mode = #tpu.pipeline_mode<synchronous>, transform_indices = @transform_1, window_bounds = array<i64: 128, 128>}, {pipeline_mode = #tpu.pipeline_mode<synchronous>, transform_indices = @transform_2, window_bounds = array<i64: 1, 128>}, {pipeline_mode = #tpu.pipeline_mode<synchronous>, transform_indices = @transform_3, window_bounds = array<i64: 128, 128>}, {pipeline_mode = #tpu.pipeline_mode<synchronous>, transform_indices = @transform_4, window_bounds = array<i64: 1, 128>}, {transform_indices = @transform_5, window_bounds = array<i64: 8, 128>}]} {
    %c0 = arith.constant 0 : index
    %c0_0 = arith.constant 0 : index
    %0 = vector.load %arg1[%c0, %c0_0] : memref<8x128xf32, #tpu.memory_space<vmem>>, vector<8x128xf32>
    %c0_1 = arith.constant 0 : index
    %c0_2 = arith.constant 0 : index
    %1 = vector.load %arg2[%c0_1, %c0_2] : memref<128x128xf32, #tpu.memory_space<vmem>>, vector<128x128xf32>
    %cst = arith.constant dense<0.000000e+00> : vector<8x128xf32>
    %2 = tpu.matmul %0, %1, %cst {dimension_numbers = #tpu.dot_dimension_numbers<[1], [0], [0], [1], [0, 0, 1, 1], [], []>} : vector<8x128xf32>, vector<128x128xf32>, vector<8x128xf32> -> vector<8x128xf32>
    %c0_3 = arith.constant 0 : index
    %c0_4 = arith.constant 0 : index
    %3 = vector.load %arg3[%c0_3, %c0_4] : memref<1x128xf32, #tpu.memory_space<vmem>>, vector<1x128xf32>
    %4 = vector.broadcast %3 : vector<1x128xf32> to vector<8x128xf32>
    %5 = arith.addf %2, %4 : vector<8x128xf32>
    %cst_5 = arith.constant 0.000000e+00 : f32
    %6 = vector.broadcast %cst_5 : f32 to vector<8x128xf32>
    %7 = arith.maximumf %5, %6 : vector<8x128xf32>
    %c0_6 = arith.constant 0 : index
    %c0_7 = arith.constant 0 : index
    %8 = vector.load %arg4[%c0_6, %c0_7] : memref<128x128xf32, #tpu.memory_space<vmem>>, vector<128x128xf32>
    %cst_8 = arith.constant dense<0.000000e+00> : vector<8x128xf32>
    %9 = tpu.matmul %7, %8, %cst_8 {dimension_numbers = #tpu.dot_dimension_numbers<[1], [0], [0], [1], [0, 0, 1, 1], [], []>} : vector<8x128xf32>, vector<128x128xf32>, vector<8x128xf32> -> vector<8x128xf32>
    %c0_9 = arith.constant 0 : index
    %c0_10 = arith.constant 0 : index
    %10 = vector.load %arg5[%c0_9, %c0_10] : memref<1x128xf32, #tpu.memory_space<vmem>>, vector<1x128xf32>
    %11 = vector.broadcast %10 : vector<1x128xf32> to vector<8x128xf32>
    %12 = arith.addf %9, %11 : vector<8x128xf32>
    %c0_11 = arith.constant 0 : index
    %c0_12 = arith.constant 0 : index
    %13 = vector.load %arg6[%c0_11, %c0_12] : memref<8x128xf32, #tpu.memory_space<vmem>>, vector<8x128xf32>
    tpu.vector_store %arg6[%c0_11, %c0_12], %12 {strides = array<i32>} : memref<8x128xf32, #tpu.memory_space<vmem>>, vector<8x128xf32>,
    return
  }
  func.func @transform_0(%arg0: i32) -> (i32, i32) {
    %c0_i32 = arith.constant 0 : i32
    %c0_i32_0 = arith.constant 0 : i32
    return %arg0, %c0_i32 : i32, i32
  }
  func.func @transform_1(%arg0: i32) -> (i32, i32) {
    %c0_i32 = arith.constant 0 : i32
    %c0_i32_0 = arith.constant 0 : i32
    %c0_i32_1 = arith.constant 0 : i32
    return %c0_i32, %c0_i32_0 : i32, i32
  }
  func.func @transform_2(%arg0: i32) -> (i32, i32) {
    %c0_i32 = arith.constant 0 : i32
    %c0_i32_0 = arith.constant 0 : i32
    %c0_i32_1 = arith.constant 0 : i32
    return %c0_i32, %c0_i32_0 : i32, i32
  }
  func.func @transform_3(%arg0: i32) -> (i32, i32) {
    %c0_i32 = arith.constant 0 : i32
    %c0_i32_0 = arith.constant 0 : i32
    %c0_i32_1 = arith.constant 0 : i32
    return %c0_i32, %c0_i32_0 : i32, i32
  }
  func.func @transform_4(%arg0: i32) -> (i32, i32) {
    %c0_i32 = arith.constant 0 : i32
    %c0_i32_0 = arith.constant 0 : i32
    %c0_i32_1 = arith.constant 0 : i32
    return %c0_i32, %c0_i32_0 : i32, i32
  }
  func.func @transform_5(%arg0: i32) -> (i32, i32) {
    %c0_i32 = arith.constant 0 : i32
    %c0_i32_0 = arith.constant 0 : i32
    return %arg0, %c0_i32 : i32, i32
  }
}

</mosaic_0001>

<bundles_post_ra>
// kernel: tpu_custom_call.1
= control target key start
LH: loop header
LB: loop body
LE: loop exit
PB: predicated region body
PF: predicated region fallthrough
CT: control target
= control target key end

     0   :  { %10 = vsyncpa [#allocation3], 0  ;;  %s637_s0 = inlined_call_operand.hbm [shape: f32[8,128], index: 0, kind: input, shape index: {}]   ;;  %s638_s1 = inlined_call_operand.hbm [shape: f32[128,128], index: 1, kind: input, shape index: {}]   ;;  %s639_s2 = inlined_call_operand.vmem [shape: f32[1,128], index: 2, kind: input, shape index: {}]   ;;  %s640_s3 = inlined_call_operand.hbm [shape: f32[128,128], index: 3, kind: input, shape index: {}]   ;;  %s641_s4 = inlined_call_operand.vmem [shape: f32[1,128], index: 4, kind: input, shape index: {}]   ;;  %s642_s5 = inlined_call_operand.hbm [shape: f32[8,128], index: 5, kind: output, shape index: {}]  }
   0x1   :  { %11 = vsyncpa [#allocation6], 0 }
   0x2   :  { %12 = vsyncpa [#allocation4], 0  ;;  %s522_s18 = smov [#allocation5]   ;;  %s428_s22 = scalar_lea.hbm %s638_s1, 2048 }
   0x3   :  { %s28_s19 = sshll.u32 %s522_s18, 4  ;;  %p429_p0 = scmp.ne.s32.totalorder %s638_s1, %s428_s22  ;;  %s29_s19 = int_to_ptr.vmem [resolvable:$true] %s28_s19 }
   0x4   :  { %p432_p1 = scmp.lt.u32.totalorder %s428_s22, %s638_s1 }
   0x6   :  { %p434_p2 = pnand %p432_p1, %p429_p0 }
   0x8   :  { %437 = shalt.err (!%p434_p2)
}
   0x9   :  { %s438_s27 = scalar_lea.vmem %s29_s19, 2048  ;;  %p443_p4 = scmp.lt.s32.totalorder %s29_s19, %s29_s19 }
   0xa   :  { %p439_p3 = scmp.ne.s32.totalorder %s29_s19, %s438_s27  ;;  %p444_p5 = scmp.lt.s32.totalorder %s438_s27, %s438_s27 }
   0xc   :  { %p445_p6 = por %p444_p5, %p443_p4 }
   0xe   :  { %p446_p7 = pnand %p445_p6, %p439_p3 }
  0x10   :  { %449 = shalt.err (!%p446_p7)
}
  0x11   :  { %s523_s28 = smov 128   ;;  %s524_s29 = smov 8  }
  0x12   :  { %34 = dma.hbm_to_vmem [thread:$0]  %s638_s1, 2048, %s29_s19, [#allocation6], %s523_s28, %s523_s28, %s524_s29  }
  0x13   :  { %s525_s7 = smov [#allocation2]   ;;  %s526_s9 = smov [#allocation7]  }
  0x14   :  { %s19_s8 = sshll.u32 %s525_s7, 4  ;;  %s42_s10 = sshll.u32 %s526_s9, 4  ;;  %s20_s8 = int_to_ptr.vmem [resolvable:$true] %s19_s8  ;;  %s43_s10 = int_to_ptr.vmem [resolvable:$true] %s42_s10 }
  0x15   :  { %s450_s13 = scalar_lea.hbm %s637_s0, 128 }
  0x16   :  { %p451_p8 = scmp.ne.s32.totalorder %s637_s0, %s450_s13  ;;  %p454_p9 = scmp.lt.u32.totalorder %s450_s13, %s637_s0 }
  0x18   :  { %p456_p10 = pnand %p454_p9, %p451_p8 }
  0x1a   :  { %459 = shalt.err (!%p456_p10)
}
  0x1b   :  { %s460_s1 = scalar_lea.vmem %s20_s8, 128  ;;  %p465_p12 = scmp.lt.s32.totalorder %s20_s8, %s20_s8 }
  0x1c   :  { %p461_p11 = scmp.ne.s32.totalorder %s20_s8, %s460_s1  ;;  %p466_p13 = scmp.lt.s32.totalorder %s460_s1, %s460_s1 }
  0x1e   :  { %p467_p0 = por %p466_p13, %p465_p12 }
  0x20   :  { %p468_p1 = pnand %p467_p0, %p461_p11 }
  0x22   :  { %471 = shalt.err (!%p468_p1)
}
  0x23   :  { %22 = dma.hbm_to_vmem [thread:$0]  %s637_s0, 128, %s20_s8, [#allocation3]  }
  0x24   :  { %s472_s22 = scalar_lea.hbm %s640_s3, 2048 }
  0x25   :  { %p473_p2 = scmp.ne.s32.totalorder %s640_s3, %s472_s22  ;;  %p476_p3 = scmp.lt.u32.totalorder %s472_s22, %s640_s3 }
  0x27   :  { %p478_p4 = pnand %p476_p3, %p473_p2 }
  0x29   :  { %481 = shalt.err (!%p478_p4)
}
  0x2a   :  { %s482_s27 = scalar_lea.vmem %s43_s10, 2048  ;;  %p487_p6 = scmp.lt.s32.totalorder %s43_s10, %s43_s10 }
  0x2b   :  { %p483_p5 = scmp.ne.s32.totalorder %s43_s10, %s482_s27  ;;  %p488_p7 = scmp.lt.s32.totalorder %s482_s27, %s482_s27 }
  0x2d   :  { %p489_p8 = por %p488_p7, %p487_p6 }
  0x2f   :  { %p490_p9 = pnand %p489_p8, %p483_p5 }
  0x31   :  { %493 = shalt.err (!%p490_p9)
}
  0x32   :  { %48 = dma.hbm_to_vmem [thread:$0]  %s640_s3, 2048, %s43_s10, [#allocation6], %s523_s28, %s523_s28, %s524_s29  }
  0x33   :  { %516 = dma.done.wait [#allocation3], 128  }
  0x34   :  { %517 = vsyncadd [#allocation3], 4294967168 }
  0x35   :  { %518 = dma.done.wait [#allocation6], 4096  }
  0x36   :  { %519 = vsyncadd [#allocation6], 4294963200  ;;  %v527_v0 = vmov 0.0|0.0   ;;  %vm528_vm0 = vmmov 0   ;;  %v529_v1 = vmov 0.0   ;;  %v61_v2 = vld [vmem:[#allocation5] sm:$0xff] }
  0x37   :  { %371 = vmatprep.subr.bf16.mxu0 %v527_v0  ;;  %333 = vmatprep.mubr.msk.f32.mxu0 %vm528_vm0, %v529_v1  ;;  %v62_v3 = vld [vmem:[#allocation5 + $0x8] sm:$0xff]  ;;  %v63_v4 = vld [vmem:[#allocation5 + $0x10] sm:$0xff]  ;;  %v64_v6 = vld [vmem:[#allocation5 + $0x18] sm:$0xff]  ;;  %s530_s7 = smov [#allocation8]  }
  0x38   :  { %395 = vmatprep.subr.bf16.mxu1 %v527_v0  ;;  %368 = vmatprep.mubr.msk.f32.mxu1 %vm528_vm0, %v529_v1  ;;  %v372_v5 = vpack.c.bf16 %v62_v3, %v61_v2  ;;  %v375_v7 = vpack.c.bf16 %v64_v6, %v63_v4  ;;  %v65_v8 = vld [vmem:[#allocation5 + $0x20] sm:$0xff]  ;;  %v66_v9 = vld [vmem:[#allocation5 + $0x28] sm:$0xff]  ;;  %v157_v12 = vld [vmem:[#allocation7 + $0x10] sm:$0xff]  ;;  %s255_s8 = sshll.u32 %s530_s7, 4  ;;  %s256_s8 = int_to_ptr.vmem [resolvable:$true] %s255_s8 }
  0x39   :  { %v155_v10 = vld [vmem:[#allocation7] sm:$0xff]  ;;  %v156_v11 = vld [vmem:[#allocation7 + $0x8] sm:$0xff]  ;;  %v158_v13 = vld [vmem:[#allocation7 + $0x18] sm:$0xff]  ;;  %v378_v14 = vpack.c.bf16 %v66_v9, %v65_v8  ;;  %s494_s9 = scalar_lea.vmem %s256_s8, 128  ;;  %p499_p11 = scmp.lt.s32.totalorder %s256_s8, %s256_s8 }
  0x3a   :  { %373 = vmatpush3.bf16.msra.mxu0 %v372_v5  ;;  %v396_v15 = vpack.c.bf16 %v156_v11, %v155_v10  ;;  %v67_v16 = vld [vmem:[#allocation5 + $0x30] sm:$0xff]  ;;  %v68_v17 = vld [vmem:[#allocation5 + $0x38] sm:$0xff]  ;;  %v399_v18 = vpack.c.bf16 %v158_v13, %v157_v12  ;;  %v159_v19 = vld [vmem:[#allocation7 + $0x20] sm:$0xff]  ;;  %p495_p10 = scmp.ne.s32.totalorder %s256_s8, %s494_s9  ;;  %p500_p12 = scmp.lt.s32.totalorder %s494_s9, %s494_s9 }
  0x3b   :  { %374 = vmatprep.subr.bf16.mxu0 %v527_v0  ;;  %v160_v20 = vld [vmem:[#allocation7 + $0x28] sm:$0xff]  ;;  %v381_v21 = vpack.c.bf16 %v68_v17, %v67_v16  ;;  %v69_v22 = vld [vmem:[#allocation5 + $0x40] sm:$0xff]  ;;  %v161_v25 = vld [vmem:[#allocation7 + $0x30] sm:$0xff] }
  0x3c   :  { %397 = vmatpush3.bf16.msra.mxu1 %v396_v15  ;;  %v70_v23 = vld [vmem:[#allocation5 + $0x48] sm:$0xff]  ;;  %v402_v24 = vpack.c.bf16 %v160_v20, %v159_v19  ;;  %v162_v26 = vld [vmem:[#allocation7 + $0x38] sm:$0xff]  ;;  %v71_v28 = vld [vmem:[#allocation5 + $0x50] sm:$0xff]  ;;  %p501_p13 = por %p500_p12, %p499_p11 }
  0x3d   :  { %398 = vmatprep.subr.bf16.mxu1 %v527_v0  ;;  %v384_v27 = vpack.c.bf16 %v70_v23, %v69_v22  ;;  %v72_v29 = vld [vmem:[#allocation5 + $0x58] sm:$0xff]  ;;  %v405_v30 = vpack.c.bf16 %v162_v26, %v161_v25  ;;  %v163_v31 = vld [vmem:[#allocation7 + $0x40] sm:$0xff]  ;;  %v164_v32 = vld [vmem:[#allocation7 + $0x48] sm:$0xff] }
  0x3e   :  { %376 = vmatpush3.bf16.msra.mxu0 %v375_v7  ;;  %v387_v33 = vpack.c.bf16 %v72_v29, %v71_v28  ;;  %v73_v34 = vld [vmem:[#allocation5 + $0x60] sm:$0xff]  ;;  %v74_v35 = vld [vmem:[#allocation5 + $0x68] sm:$0xff]  ;;  %v408_v36 = vpack.c.bf16 %v164_v32, %v163_v31  ;;  %v165_v37 = vld [vmem:[#allocation7 + $0x50] sm:$0xff]  ;;  %p502_p0 = pnand %p501_p13, %p495_p10 }
  0x3f   :  { %377 = vmatprep.subr.bf16.mxu0 %v527_v0  ;;  %v166_v38 = vld [vmem:[#allocation7 + $0x58] sm:$0xff]  ;;  %v390_v39 = vpack.c.bf16 %v74_v35, %v73_v34  ;;  %v75_v40 = vld [vmem:[#allocation5 + $0x70] sm:$0xff]  ;;  %v167_v43 = vld [vmem:[#allocation7 + $0x60] sm:$0xff] }
  0x40   :  { %400 = vmatpush3.bf16.msra.mxu1 %v399_v18  ;;  %v76_v41 = vld [vmem:[#allocation5 + $0x78] sm:$0xff]  ;;  %v411_v42 = vpack.c.bf16 %v166_v38, %v165_v37  ;;  %v168_v44 = vld [vmem:[#allocation7 + $0x68] sm:$0xff]  ;;  %v169_v48 = vld [vmem:[#allocation7 + $0x70] sm:$0xff] }
  0x41   :  { %401 = vmatprep.subr.bf16.mxu1 %v527_v0  ;;  %v393_v45 = vpack.c.bf16 %v76_v41, %v75_v40  ;;  %v414_v46 = vpack.c.bf16 %v168_v44, %v167_v43  ;;  %v60_v47 = vld [vmem:[#allocation2] sm:$0xff] }
  0x42   :  { %379 = vmatpush3.bf16.msra.mxu0 %v378_v14  ;;  %v170_v49 = vld [vmem:[#allocation7 + $0x78] sm:$0xff] }
  0x43   :  { %380 = vmatprep.subr.bf16.mxu0 %v527_v0  ;;  %v417_v50 = vpack.c.bf16 %v170_v49, %v169_v48  ;;  %v265_v51 = vld [vmem:[%s639_s2] ss:$0 sm:$0xff] }
  0x44   :  { %403 = vmatpush3.bf16.msra.mxu1 %v402_v24  ;;  %v266_v56 = vld [vmem:[%s641_s4] ss:$0 sm:$0xff] }
  0x45   :  { %404 = vmatprep.subr.bf16.mxu1 %v527_v0 }
  0x46   :  { %382 = vmatpush3.bf16.msra.mxu0 %v381_v21 }
  0x47   :  { %383 = vmatprep.subr.bf16.mxu0 %v527_v0 }
  0x48   :  { %406 = vmatpush3.bf16.msra.mxu1 %v405_v30 }
  0x49   :  { %407 = vmatprep.subr.bf16.mxu1 %v527_v0 }
  0x4a   :  { %385 = vmatpush3.bf16.msra.mxu0 %v384_v27 }
  0x4b   :  { %386 = vmatprep.subr.bf16.mxu0 %v527_v0 }
  0x4c   :  { %409 = vmatpush3.bf16.msra.mxu1 %v408_v36 }
  0x4d   :  { %410 = vmatprep.subr.bf16.mxu1 %v527_v0 }
  0x4e   :  { %388 = vmatpush3.bf16.msra.mxu0 %v387_v33 }
  0x4f   :  { %389 = vmatprep.subr.bf16.mxu0 %v527_v0 }
  0x50   :  { %412 = vmatpush3.bf16.msra.mxu1 %v411_v42 }
  0x51   :  { %413 = vmatprep.subr.bf16.mxu1 %v527_v0 }
  0x52   :  { %391 = vmatpush3.bf16.msra.mxu0 %v390_v39 }
  0x53   :  { %392 = vmatprep.subr.bf16.mxu0 %v527_v0 }
  0x54   :  { %415 = vmatpush3.bf16.msra.mxu1 %v414_v46 }
  0x55   :  { %416 = vmatprep.subr.bf16.mxu1 %v527_v0 }
  0x56   :  { %394 = vmatpush3.bf16.msra.mxu0 %v393_v45 }
  0x58   :  { %418 = vmatpush3.bf16.msra.mxu1 %v417_v50 }
  0x59   :  { %334 = vmatmul.mubr.f32.vlgmr.msra.gmra.mrb[0].mxu0 %v60_v47 }
 0x12c   :  { %v150_v52 = vpop.f32.mrb[0].mxu0 }
 0x12d   :  { %v151_v53 = vadd.f32 %v265_v51, %v150_v52  ;;  %v335_v54 = vpop.f32.mrb[1].mxu0 }
 0x12f   :  { %v154_v55 = vmax.f32 %v151_v53, 0.0 }
 0x131   :  { %369 = vmatmul.mubr.f32.vlgmr.msra.gmra.mrb[0].mxu1 %v154_v55 }
 0x204   :  { %v244_v57 = vpop.f32.mrb[0].mxu1 }
 0x205   :  { %v245_v58 = vadd.f32 %v266_v56, %v244_v57  ;;  %v370_v59 = vpop.f32.mrb[1].mxu1 }
 0x207   :  { %248 = vst [vmem:[#allocation8] sm:$0xff] %v245_v58 }
 0x208   :  { %505 = shalt.err (!%p502_p0)
}
 0x209   :  { %s506_s11 = scalar_lea.hbm %s642_s5, 128 }
 0x20a   :  { %p507_p1 = scmp.ne.s32.totalorder %s642_s5, %s506_s11  ;;  %p510_p2 = scmp.lt.u32.totalorder %s506_s11, %s642_s5 }
 0x20c   :  { %p512_p3 = pnand %p510_p2, %p507_p1 }
 0x20e   :  { %515 = shalt.err (!%p512_p3)
}
 0x20f   :  { %258 = dma.vmem_to_hbm [thread:$0]  %s256_s8, 128, %s642_s5, [#allocation4]  }
 0x210   :  { %520 = dma.done.wait [#allocation4], 128  }
 0x211   :  { %521 = vsyncadd [#allocation4], 4294967168 }
 0x212   :  { %262 = vsyncpa [#allocation3], 1 }
 0x213   :  { %263 = vsyncpa [#allocation6], 1 }
 0x214   :  { %264 = vsyncpa [#allocation4], 1 }

</bundles_post_ra>
